<compile_context>
chip_gen: v5e
topology: v5e:2x2
jax: 0.10.0
libtpu: 0.0.40
codegen_flags: <defaults>
</compile_context>

<pallas_src>
import functools

import jax
import jax.numpy as jnp
from jax.experimental import pallas as pl
from jax.experimental.pallas import tpu as pltpu


_LANE = 1024  # lane-dense last dim (multiple of 128)


def _min_sublane(dtype) -> int:
    """Minimum sublane tile multiple for a dtype (8 f32 / 16 bf16 / 32 int8)."""
    bits = jnp.dtype(dtype).itemsize * 8
    if bits >= 32:
        return 8
    if bits == 16:
        return 16
    return 32


def _pow_static(x, p: int):
    """x ** p for static int p >= 1 via exponentiation-by-squaring."""
    result = None
    base = x
    while p > 0:
        if p & 1:
            result = base if result is None else result * base
        p >>= 1
        if p:
            base = base * base
    return result


def _relu_k_kernel(x_ref, o_ref, *, p: int):
    x = x_ref[...]
    if p == 0:
        # torch.pow(relu(x), 0) == 1 everywhere (torch defines 0**0 == 1).
        o_ref[...] = jnp.ones_like(x).astype(o_ref.dtype)
        return
    r = jnp.maximum(x, jnp.zeros_like(x))
    o_ref[...] = _pow_static(r, p).astype(o_ref.dtype)


def relu_k(x: jax.Array, p: int = 1) -> jax.Array:
    """Pallas TPU implementation of torch.pow(F.relu(x), p)."""
    orig_shape = x.shape
    orig_dtype = x.dtype
    total = int(x.size)
    if total == 0:
        return x

    min_sub = _min_sublane(orig_dtype)
    itemsize = jnp.dtype(orig_dtype).itemsize

    # Rows of the lane-dense (rows, _LANE) slab.
    rows = pl.cdiv(total, _LANE)

    # Target ~2 MiB per tile -> 2 in-bufs + 2 out-bufs stays well under the
    # scoped VMEM limit on all of v5e / v6e / v7x (no vmem_limit override
    # needed) while hitting the elementwise HBM roofline.
    target_bytes = 2 * 1024 * 1024
    target_tr = max(min_sub, (target_bytes // (_LANE * itemsize)) // min_sub * min_sub)

    # Row tile: sublane-aligned, never larger than the (padded-up) row count.
    tr = min(target_tr, ((rows + min_sub - 1) // min_sub) * min_sub)
    rows_padded = ((rows + tr - 1) // tr) * tr
    padded_total = rows_padded * _LANE

    flat = x.reshape(-1)
    if padded_total != total:
        flat = jnp.pad(flat, (0, padded_total - total))
    x2 = flat.reshape(rows_padded, _LANE)

    grid = (rows_padded // tr,)
    out2 = pl.pallas_call(
        functools.partial(_relu_k_kernel, p=p),
        out_shape=jax.ShapeDtypeStruct((rows_padded, _LANE), orig_dtype),
        grid=grid,
        in_specs=[pl.BlockSpec((tr, _LANE), lambda i: (i, 0))],
        out_specs=pl.BlockSpec((tr, _LANE), lambda i: (i, 0)),
        compiler_params=pltpu.CompilerParams(
            # Single parallel axis: shards across TCs on megacore / v7x,
            # no-op on single-TC v5e/v6e.
            dimension_semantics=("parallel",),
        ),
    )(x2)

    return out2.reshape(-1)[:total].reshape(orig_shape)


if __name__ == "__main__":
    key = jax.random.PRNGKey(0)
    # NCHW, small shape consistent with a conv-style activation input.
    x = jax.random.normal(key, (2, 4, 16, 16), dtype=jnp.float32)

    p = 2  # exercise the pow path
    y = relu_k(x, p=p)
    y = jax.block_until_ready(y)
    ref = jnp.power(jnp.maximum(x, 0.0), p)
    assert y.shape == x.shape and y.dtype == x.dtype
    assert jnp.allclose(y, ref, atol=1e-6, rtol=1e-6)

    # Also check the p=1 (plain ReLU) path.
    y1 = jax.block_until_ready(relu_k(x, p=1))
    assert jnp.allclose(y1, jnp.maximum(x, 0.0), atol=1e-6, rtol=1e-6)

    print("KERNEL_OK")
</pallas_src>

<mosaic_0001>
module attributes {stable_mosaic.version = 11 : i64} {
  func.func @_relu_k_kernel(%arg0: i32, %arg1: memref<8x1024xf32, #tpu.memory_space<vmem>>, %arg2: memref<8x1024xf32, #tpu.memory_space<vmem>>) attributes {dimension_semantics = [#tpu.dimension_semantics<parallel>], iteration_bounds = array<i64: 1>, scalar_prefetch = 0 : i64, scratch_operands = 0 : i64, tpu.core_type = #tpu.core_type<tc>, window_params = [{transform_indices = @transform_0, window_bounds = array<i64: 8, 1024>}, {transform_indices = @transform_1, window_bounds = array<i64: 8, 1024>}]} {
    %c0 = arith.constant 0 : index
    %c0_0 = arith.constant 0 : index
    %0 = vector.load %arg1[%c0, %c0_0] : memref<8x1024xf32, #tpu.memory_space<vmem>>, vector<8x1024xf32>
    %cst = arith.constant 0.000000e+00 : f32
    %1 = vector.broadcast %cst : f32 to vector<8x1024xf32>
    %2 = arith.maximumf %0, %1 : vector<8x1024xf32>
    %3 = arith.mulf %2, %2 : vector<8x1024xf32>
    %c0_1 = arith.constant 0 : index
    %c0_2 = arith.constant 0 : index
    %4 = vector.load %arg2[%c0_1, %c0_2] : memref<8x1024xf32, #tpu.memory_space<vmem>>, vector<8x1024xf32>
    tpu.vector_store %arg2[%c0_1, %c0_2], %3 {strides = array<i32>} : memref<8x1024xf32, #tpu.memory_space<vmem>>, vector<8x1024xf32>,
    return
  }
  func.func @transform_0(%arg0: i32) -> (i32, i32) {
    %c0_i32 = arith.constant 0 : i32
    %c0_i32_0 = arith.constant 0 : i32
    return %arg0, %c0_i32 : i32, i32
  }
  func.func @transform_1(%arg0: i32) -> (i32, i32) {
    %c0_i32 = arith.constant 0 : i32
    %c0_i32_0 = arith.constant 0 : i32
    return %arg0, %c0_i32 : i32, i32
  }
}

</mosaic_0001>

<bundles_post_ra>
// kernel: tpu_custom_call.1
= control target key start
LH: loop header
LB: loop body
LE: loop exit
PB: predicated region body
PF: predicated region fallthrough
CT: control target
= control target key end

     0   :  { %6 = vsyncpa [#allocation3], 0  ;;  %s144_s0 = inlined_call_operand.hbm [shape: f32[8,1024], index: 0, kind: input, shape index: {}]   ;;  %s145_s1 = inlined_call_operand.hbm [shape: f32[8,1024], index: 1, kind: output, shape index: {}]  }
   0x1   :  { %7 = vsyncpa [#allocation4], 0  ;;  %s13_s8 = sshll.u32 %s144_s0, 4  ;;  %s126_s9 = smov [#allocation2]   ;;  %s14_s8 = int_to_ptr.hbm [resolvable:$true] %s13_s8 }
   0x2   :  { %s15_s10 = sshll.u32 %s126_s9, 4  ;;  %s16_s10 = int_to_ptr.vmem [resolvable:$true] %s15_s10 }
   0x3   :  { %18 = dma.hbm_to_vmem [thread:$0]  %s14_s8, 1024, %s16_s10, [#allocation3]  }
   0x4   :  { %122 = dma.done.wait [#allocation3], 1024  }
   0x5   :  { %123 = vsyncadd [#allocation3], 4294966272  ;;  %v23_v0 = vld [vmem:[#allocation2] sm:$0xff]  ;;  %v24_v1 = vld [vmem:[#allocation2 + $0x8] sm:$0xff]  ;;  %s127_s0 = smov [#allocation5]   ;;  %s62_s14 = sshll.u32 %s145_s1, 4  ;;  %s63_s14 = int_to_ptr.hbm [resolvable:$true] %s62_s14 }
   0x6   :  { %v25_v2 = vld [vmem:[#allocation2 + $0x10] sm:$0xff]  ;;  %v31_v3 = vmax.f32 %v23_v0, 0.0  ;;  %v32_v4 = vmax.f32 %v24_v1, 0.0  ;;  %v26_v6 = vld [vmem:[#allocation2 + $0x18] sm:$0xff]  ;;  %v27_v7 = vld [vmem:[#allocation2 + $0x20] sm:$0xff]  ;;  %s60_s11 = sshll.u32 %s127_s0, 4  ;;  %s61_s11 = int_to_ptr.vmem [resolvable:$true] %s60_s11 }
   0x7   :  { %v33_v5 = vmax.f32 %v25_v2, 0.0  ;;  %v28_v8 = vld [vmem:[#allocation2 + $0x28] sm:$0xff]  ;;  %v34_v9 = vmax.f32 %v26_v6, 0.0  ;;  %v35_v10 = vmax.f32 %v27_v7, 0.0  ;;  %v29_v12 = vld [vmem:[#allocation2 + $0x30] sm:$0xff]  ;;  %v30_v13 = vld [vmem:[#allocation2 + $0x38] sm:$0xff] }
   0x8   :  { %v36_v11 = vmax.f32 %v28_v8, 0.0  ;;  %v39_v14 = vmul.f32 %v31_v3, %v31_v3  ;;  %v40_v15 = vmul.f32 %v32_v4, %v32_v4  ;;  %v37_v17 = vmax.f32 %v29_v12, 0.0 }
   0x9   :  { %v41_v16 = vmul.f32 %v33_v5, %v33_v5  ;;  %v42_v18 = vmul.f32 %v34_v9, %v34_v9  ;;  %v38_v19 = vmax.f32 %v30_v13, 0.0  ;;  %v43_v20 = vmul.f32 %v35_v10, %v35_v10 }
   0xa   :  { %47 = vst [vmem:[#allocation5] sm:$0xff] %v39_v14  ;;  %v44_v21 = vmul.f32 %v36_v11, %v36_v11  ;;  %v45_v22 = vmul.f32 %v37_v17, %v37_v17 }
   0xb   :  { %48 = vst [vmem:[#allocation5 + $0x8] sm:$0xff] %v40_v15  ;;  %v46_v23 = vmul.f32 %v38_v19, %v38_v19 }
   0xc   :  { %49 = vst [vmem:[#allocation5 + $0x10] sm:$0xff] %v41_v16 }
   0xd   :  { %50 = vst [vmem:[#allocation5 + $0x18] sm:$0xff] %v42_v18 }
   0xe   :  { %51 = vst [vmem:[#allocation5 + $0x20] sm:$0xff] %v43_v20 }
   0xf   :  { %52 = vst [vmem:[#allocation5 + $0x28] sm:$0xff] %v44_v21 }
  0x10   :  { %53 = vst [vmem:[#allocation5 + $0x30] sm:$0xff] %v45_v22 }
  0x11   :  { %54 = vst [vmem:[#allocation5 + $0x38] sm:$0xff] %v46_v23 }
  0x12   :  { %65 = dma.vmem_to_hbm [thread:$0]  %s61_s11, 1024, %s63_s14, [#allocation4]  }
  0x13   :  { %124 = dma.done.wait [#allocation4], 1024  }
  0x14   :  { %125 = vsyncadd [#allocation4], 4294966272 }
  0x15   :  { %70 = vsyncpa [#allocation3], 1 }
  0x16   :  { %71 = vsyncpa [#allocation4], 1 }

</bundles_post_ra>
